<compile_context>
chip_gen: v5e
topology: v5e:2x2
jax: 0.10.0
libtpu: 0.0.40
codegen_flags: <defaults>
</compile_context>

<pallas_src>
import jax
import jax.numpy as jnp
from jax.experimental import pallas as pl
from jax.experimental.pallas import tpu as pltpu

SMOOTH = 1e-7
A_COEF = 0.3
B_COEF = 0.4


def _region_stats_kernel(ah_ref, aw_ref, p_ref, l_ref, out_ref):
    """Accumulate per-region sums of (p*l, p, l) over the batch axis.

    Block layouts:
      ah_ref : (C, rpc, CH)       f32  H-bin 0/1 pooling matrix (batched over C)
      aw_ref : (C, W, Rw)         f32  W-bin 0/1 pooling matrix (batched over C)
      p_ref  : (1, C, CH, W)      native dtype
      l_ref  : (1, C, CH, W)      native dtype
      out_ref: (1, 3*C, rpc, Rw)  f32  accumulator, resident across the n axis
    """
    n = pl.program_id(1)
    C = p_ref.shape[1]

    @pl.when(n == 0)
    def _init():
        out_ref[...] = jnp.zeros(out_ref.shape, out_ref.dtype)

    p = p_ref[0].astype(jnp.float32)          # (C, CH, W) — upcast on-chip
    l = l_ref[0].astype(jnp.float32)
    ah = ah_ref[...]                          # (C, rpc, CH)
    aw = aw_ref[...]                          # (C, W, Rw)

    def pool(x):
        # H-bin reduction first (wide W stays as the MXU N dimension) ...
        y = jnp.einsum("ckh,chw->ckw", ah, x,
                       preferred_element_type=jnp.float32)      # (C, rpc, W)
        # ... then W-bin reduction on the bh-times-smaller intermediate.
        return jnp.einsum("ckw,cwr->ckr", y, aw,
                          preferred_element_type=jnp.float32)   # (C, rpc, Rw)

    out_ref[0, 0:C] += pool(p * l)            # sum(p*l): single mul per element
    out_ref[0, C:2 * C] += pool(p)            # sum(p)
    out_ref[0, 2 * C:3 * C] += pool(l)        # sum(l)


def binary_adaptive_region_tversky_loss(preds, labels,
                                        num_region_per_axis=(16, 16),
                                        smooth=SMOOTH, A=A_COEF, B=B_COEF):
    N, C, H, W = preds.shape
    Rh, Rw = num_region_per_axis
    assert H % Rh == 0 and W % Rw == 0, "kernel assumes divisible pooling"
    bh, bw = H // Rh, W // Rw

    p_size = preds.dtype.itemsize
    l_size = labels.dtype.itemsize

    # ---- choose rows-per-block: CH = rpc * bh with rpc | Rh -----------------
    # Second-to-last block dim must be a multiple of the sublane tile
    # (8 rows f32 / 16 bf16 / 32 int8) or equal the full H extent.
    sub_mult = max(8, 32 // min(p_size, l_size))
    cands = [d for d in range(1, Rh + 1)
             if Rh % d == 0 and ((d * bh) % sub_mult == 0 or d * bh == H)]
    target_bytes = 2 << 20                           # ~2 MiB per input block
    row_bytes = C * W * max(p_size, l_size)
    fitting = [d for d in cands if d * bh * row_bytes <= target_bytes]
    rpc = max(fitting) if fitting else min(cands)
    CH = rpc * bh
    grid_h = Rh // rpc

    # ---- 0/1 bin-sum pooling matrices (tiny; constant index map => DMA once)
    ah = (jnp.arange(CH)[None, :] // bh
          == jnp.arange(rpc)[:, None]).astype(jnp.float32)       # (rpc, CH)
    aw = (jnp.arange(W)[:, None] // bw
          == jnp.arange(Rw)[None, :]).astype(jnp.float32)        # (W, Rw)
    ah_b = jnp.broadcast_to(ah[None], (C, rpc, CH))
    aw_b = jnp.broadcast_to(aw[None], (C, W, Rw))

    # ---- VMEM budget from actual block sizes (+ headroom) -------------------
    in_block_bytes = C * CH * W * (p_size + l_size)
    vmem_needed = (2 * in_block_bytes                     # 2 inputs x 2 buffers
                   + 2 * 4 * (C * rpc * CH + C * W * Rw)  # pooling matrices
                   + 2 * 4 * (3 * C * rpc * Rw)           # resident output
                   + (4 << 20))
    vmem_limit = int(max(16 << 20, min(128 << 20, vmem_needed)))

    stats = pl.pallas_call(
        _region_stats_kernel,
        out_shape=jax.ShapeDtypeStruct((grid_h, 3 * C, rpc, Rw), jnp.float32),
        grid_spec=pltpu.PrefetchScalarGridSpec(
            num_scalar_prefetch=0,
            grid=(grid_h, N),                  # batch (reduction) axis innermost
            in_specs=[
                pl.BlockSpec((C, rpc, CH), lambda g, n: (0, 0, 0)),
                pl.BlockSpec((C, W, Rw), lambda g, n: (0, 0, 0)),
                pl.BlockSpec((1, C, CH, W), lambda g, n: (n, 0, g, 0)),
                pl.BlockSpec((1, C, CH, W), lambda g, n: (n, 0, g, 0)),
            ],
            out_specs=pl.BlockSpec((1, 3 * C, rpc, Rw),
                                   lambda g, n: (g, 0, 0, 0)),
        ),
        compiler_params=pltpu.CompilerParams(
            dimension_semantics=("parallel", "arbitrary"),
            vmem_limit_bytes=vmem_limit),
    )(ah_b, aw_b, preds, labels)

    # ---- tiny finalize in plain JAX (region Tversky + scalar reduction) -----
    stats = stats.reshape(grid_h, 3, C, rpc, Rw)
    stats = jnp.transpose(stats, (1, 2, 0, 3, 4)).reshape(3, C, Rh, Rw)
    s_pl, s_p, s_l = stats[0], stats[1], stats[2]
    inv_k = 1.0 / float(bh * bw)                 # adaptive-avg-pool bin mean
    rtp = s_pl * inv_k
    rfp = (s_p - s_pl) * inv_k                   # sum p(1-l)  = sum p - sum pl
    rfn = (s_l - s_pl) * inv_k                   # sum (1-p)l  = sum l - sum pl
    denom = rfp + rfn + smooth
    alpha = A + B * (rfp + smooth) / denom
    beta = A + B * (rfn + smooth) / denom
    tversky = 1.0 - (rtp + smooth) / (rtp + alpha * rfp + beta * rfn + smooth)
    return tversky.sum(axis=(1, 2)).mean()


def _reference_loss(preds, labels, num_region_per_axis=(16, 16),
                    smooth=SMOOTH, A=A_COEF, B=B_COEF):
    """Pure-JAX reference mirroring the PyTorch module (divisible case)."""
    N, C, H, W = preds.shape
    Rh, Rw = num_region_per_axis
    bh, bw = H // Rh, W // Rw

    def pool(x):
        return x.reshape(N, C, Rh, bh, Rw, bw).mean(axis=(3, 5))

    tp = preds * labels
    fp = preds * (1.0 - labels)
    fn = (1.0 - preds) * labels
    rtp = pool(tp).sum(0)
    rfp = pool(fp).sum(0)
    rfn = pool(fn).sum(0)
    alpha = A + B * (rfp + smooth) / (rfp + rfn + smooth)
    beta = A + B * (rfn + smooth) / (rfp + rfn + smooth)
    t = 1.0 - (rtp + smooth) / (rtp + alpha * rfp + beta * rfn + smooth)
    return t.sum(axis=(1, 2)).mean()


if __name__ == "__main__":
    key = jax.random.PRNGKey(0)
    k1, k2 = jax.random.split(key)

    N, C, H, W = 2, 4, 32, 32          # (16, 16) regions -> 2x2 pooling bins
    preds = jax.nn.sigmoid(jax.random.normal(k1, (N, C, H, W), jnp.float32))
    labels = jax.random.bernoulli(k2, 0.5, (N, C, H, W)).astype(jnp.float32)

    # f32 path vs faithful reference.
    loss = jax.block_until_ready(
        binary_adaptive_region_tversky_loss(preds, labels))
    ref = jax.block_until_ready(_reference_loss(preds, labels))
    assert jnp.allclose(loss, ref, rtol=1e-4, atol=1e-5), (loss, ref)

    # Native bf16 path: inputs are DMA'd as bf16 and upcast on-chip.
    p16 = preds.astype(jnp.bfloat16)
    l16 = labels.astype(jnp.bfloat16)
    loss16 = jax.block_until_ready(
        binary_adaptive_region_tversky_loss(p16, l16))
    ref16 = jax.block_until_ready(
        _reference_loss(p16.astype(jnp.float32), l16.astype(jnp.float32)))
    assert jnp.allclose(loss16, ref16, rtol=1e-3, atol=1e-4), (loss16, ref16)

    print("KERNEL_OK")
</pallas_src>

<mosaic_0001>
module attributes {stable_mosaic.version = 11 : i64} {
  func.func @_region_stats_kernel(%arg0: i32, %arg1: i32, %arg2: memref<4x16x32xf32, #tpu.memory_space<vmem>>, %arg3: memref<4x32x16xf32, #tpu.memory_space<vmem>>, %arg4: memref<1x4x32x32xf32, #tpu.memory_space<vmem>>, %arg5: memref<1x4x32x32xf32, #tpu.memory_space<vmem>>, %arg6: memref<1x12x16x16xf32, #tpu.memory_space<vmem>>) attributes {dimension_semantics = [#tpu.dimension_semantics<parallel>, #tpu.dimension_semantics<arbitrary>], iteration_bounds = array<i64: 1, 2>, scalar_prefetch = 0 : i64, scratch_operands = 0 : i64, tpu.core_type = #tpu.core_type<tc>, window_params = [{pipeline_mode = #tpu.pipeline_mode<synchronous>, transform_indices = @transform_0, window_bounds = array<i64: 4, 16, 32>}, {pipeline_mode = #tpu.pipeline_mode<synchronous>, transform_indices = @transform_1, window_bounds = array<i64: 4, 32, 16>}, {transform_indices = @transform_2, window_bounds = array<i64: 1, 4, 32, 32>}, {transform_indices = @transform_3, window_bounds = array<i64: 1, 4, 32, 32>}, {transform_indices = @transform_4, window_bounds = array<i64: 1, 12, 16, 16>}]} {
    %c0_i32 = arith.constant 0 : i32
    %0 = arith.cmpi eq, %arg1, %c0_i32 : i32
    %1 = arith.extui %0 : i1 to i32
    %c0_i32_0 = arith.constant 0 : i32
    %2 = arith.cmpi ne, %1, %c0_i32_0 : i32
    scf.if %2 {
      %cst_41 = arith.constant 0.000000e+00 : f32
      %34 = vector.broadcast %cst_41 : f32 to vector<1x12x16x16xf32>
      %c0_42 = arith.constant 0 : index
      %c0_43 = arith.constant 0 : index
      %c0_44 = arith.constant 0 : index
      %c0_45 = arith.constant 0 : index
      %35 = vector.load %arg6[%c0_42, %c0_43, %c0_44, %c0_45] : memref<1x12x16x16xf32, #tpu.memory_space<vmem>>, vector<1x12x16x16xf32>
      tpu.vector_store %arg6[%c0_42, %c0_43, %c0_44, %c0_45], %34 {strides = array<i32>} : memref<1x12x16x16xf32, #tpu.memory_space<vmem>>, vector<1x12x16x16xf32>,
    } else {
    }
    %c0 = arith.constant 0 : index
    %c0_1 = arith.constant 0 : index
    %c0_2 = arith.constant 0 : index
    %c0_3 = arith.constant 0 : index
    %3 = vector.load %arg4[%c0, %c0_1, %c0_2, %c0_3] : memref<1x4x32x32xf32, #tpu.memory_space<vmem>>, vector<1x4x32x32xf32>
    %4 = vector.shape_cast %3 : vector<1x4x32x32xf32> to vector<4x32x32xf32>
    %c0_4 = arith.constant 0 : index
    %c0_5 = arith.constant 0 : index
    %c0_6 = arith.constant 0 : index
    %c0_7 = arith.constant 0 : index
    %5 = vector.load %arg5[%c0_4, %c0_5, %c0_6, %c0_7] : memref<1x4x32x32xf32, #tpu.memory_space<vmem>>, vector<1x4x32x32xf32>
    %6 = vector.shape_cast %5 : vector<1x4x32x32xf32> to vector<4x32x32xf32>
    %c0_8 = arith.constant 0 : index
    %c0_9 = arith.constant 0 : index
    %c0_10 = arith.constant 0 : index
    %7 = vector.load %arg2[%c0_8, %c0_9, %c0_10] : memref<4x16x32xf32, #tpu.memory_space<vmem>>, vector<4x16x32xf32>
    %c0_11 = arith.constant 0 : index
    %c0_12 = arith.constant 0 : index
    %c0_13 = arith.constant 0 : index
    %8 = vector.load %arg3[%c0_11, %c0_12, %c0_13] : memref<4x32x16xf32, #tpu.memory_space<vmem>>, vector<4x32x16xf32>
    %c0_14 = arith.constant 0 : index
    %c0_15 = arith.constant 0 : index
    %c0_16 = arith.constant 0 : index
    %c0_17 = arith.constant 0 : index
    %9 = vector.load %arg6[%c0_14, %c0_15, %c0_16, %c0_17] : memref<1x12x16x16xf32, #tpu.memory_space<vmem>>, vector<1x4x16x16xf32>
    %10 = vector.shape_cast %9 : vector<1x4x16x16xf32> to vector<4x16x16xf32>
    %11 = arith.mulf %4, %6 : vector<4x32x32xf32>
    "tpu.trace_start"() <{level = 10 : i32, message = "ckh,chw->ckw"}> : () -> ()
    %cst = arith.constant dense<0.000000e+00> : vector<4x16x32xf32>
    %12 = tpu.matmul %7, %11, %cst {dimension_numbers = #tpu.dot_dimension_numbers<[2], [1], [1], [2], [0, 0, 0, 1, 1, 2], [0], [0]>} : vector<4x16x32xf32>, vector<4x32x32xf32>, vector<4x16x32xf32> -> vector<4x16x32xf32>
    "tpu.trace_stop"() : () -> ()
    "tpu.trace_start"() <{level = 10 : i32, message = "ckw,cwr->ckr"}> : () -> ()
    %cst_18 = arith.constant dense<0.000000e+00> : vector<4x16x16xf32>
    %13 = tpu.matmul %12, %8, %cst_18 {dimension_numbers = #tpu.dot_dimension_numbers<[2], [1], [1], [2], [0, 0, 0, 1, 1, 2], [0], [0]>} : vector<4x16x32xf32>, vector<4x32x16xf32>, vector<4x16x16xf32> -> vector<4x16x16xf32>
    "tpu.trace_stop"() : () -> ()
    %14 = arith.addf %10, %13 : vector<4x16x16xf32>
    %c0_19 = arith.constant 0 : index
    %c0_20 = arith.constant 0 : index
    %c0_21 = arith.constant 0 : index
    %c0_22 = arith.constant 0 : index
    %15 = vector.load %arg6[%c0_19, %c0_20, %c0_21, %c0_22] : memref<1x12x16x16xf32, #tpu.memory_space<vmem>>, vector<1x4x16x16xf32>
    %16 = vector.shape_cast %15 : vector<1x4x16x16xf32> to vector<4x16x16xf32>
    %17 = vector.shape_cast %14 : vector<4x16x16xf32> to vector<1x4x16x16xf32>
    tpu.vector_store %arg6[%c0_19, %c0_20, %c0_21, %c0_22], %17 {strides = array<i32>} : memref<1x12x16x16xf32, #tpu.memory_space<vmem>>, vector<1x4x16x16xf32>,
    %c0_23 = arith.constant 0 : index
    %c4 = arith.constant 4 : index
    %c0_24 = arith.constant 0 : index
    %c0_25 = arith.constant 0 : index
    %18 = vector.load %arg6[%c0_23, %c4, %c0_24, %c0_25] : memref<1x12x16x16xf32, #tpu.memory_space<vmem>>, vector<1x4x16x16xf32>
    %19 = vector.shape_cast %18 : vector<1x4x16x16xf32> to vector<4x16x16xf32>
    "tpu.trace_start"() <{level = 10 : i32, message = "ckh,chw->ckw"}> : () -> ()
    %cst_26 = arith.constant dense<0.000000e+00> : vector<4x16x32xf32>
    %20 = tpu.matmul %7, %4, %cst_26 {dimension_numbers = #tpu.dot_dimension_numbers<[2], [1], [1], [2], [0, 0, 0, 1, 1, 2], [0], [0]>} : vector<4x16x32xf32>, vector<4x32x32xf32>, vector<4x16x32xf32> -> vector<4x16x32xf32>
    "tpu.trace_stop"() : () -> ()
    "tpu.trace_start"() <{level = 10 : i32, message = "ckw,cwr->ckr"}> : () -> ()
    %cst_27 = arith.constant dense<0.000000e+00> : vector<4x16x16xf32>
    %21 = tpu.matmul %20, %8, %cst_27 {dimension_numbers = #tpu.dot_dimension_numbers<[2], [1], [1], [2], [0, 0, 0, 1, 1, 2], [0], [0]>} : vector<4x16x32xf32>, vector<4x32x16xf32>, vector<4x16x16xf32> -> vector<4x16x16xf32>
    "tpu.trace_stop"() : () -> ()
    %22 = arith.addf %19, %21 : vector<4x16x16xf32>
    %c0_28 = arith.constant 0 : index
    %c4_29 = arith.constant 4 : index
    %c0_30 = arith.constant 0 : index
    %c0_31 = arith.constant 0 : index
    %23 = vector.load %arg6[%c0_28, %c4_29, %c0_30, %c0_31] : memref<1x12x16x16xf32, #tpu.memory_space<vmem>>, vector<1x4x16x16xf32>
    %24 = vector.shape_cast %23 : vector<1x4x16x16xf32> to vector<4x16x16xf32>
    %25 = vector.shape_cast %22 : vector<4x16x16xf32> to vector<1x4x16x16xf32>
    tpu.vector_store %arg6[%c0_28, %c4_29, %c0_30, %c0_31], %25 {strides = array<i32>} : memref<1x12x16x16xf32, #tpu.memory_space<vmem>>, vector<1x4x16x16xf32>,
    %c0_32 = arith.constant 0 : index
    %c8 = arith.constant 8 : index
    %c0_33 = arith.constant 0 : index
    %c0_34 = arith.constant 0 : index
    %26 = vector.load %arg6[%c0_32, %c8, %c0_33, %c0_34] : memref<1x12x16x16xf32, #tpu.memory_space<vmem>>, vector<1x4x16x16xf32>
    %27 = vector.shape_cast %26 : vector<1x4x16x16xf32> to vector<4x16x16xf32>
    "tpu.trace_start"() <{level = 10 : i32, message = "ckh,chw->ckw"}> : () -> ()
    %cst_35 = arith.constant dense<0.000000e+00> : vector<4x16x32xf32>
    %28 = tpu.matmul %7, %6, %cst_35 {dimension_numbers = #tpu.dot_dimension_numbers<[2], [1], [1], [2], [0, 0, 0, 1, 1, 2], [0], [0]>} : vector<4x16x32xf32>, vector<4x32x32xf32>, vector<4x16x32xf32> -> vector<4x16x32xf32>
    "tpu.trace_stop"() : () -> ()
    "tpu.trace_start"() <{level = 10 : i32, message = "ckw,cwr->ckr"}> : () -> ()
    %cst_36 = arith.constant dense<0.000000e+00> : vector<4x16x16xf32>
    %29 = tpu.matmul %28, %8, %cst_36 {dimension_numbers = #tpu.dot_dimension_numbers<[2], [1], [1], [2], [0, 0, 0, 1, 1, 2], [0], [0]>} : vector<4x16x32xf32>, vector<4x32x16xf32>, vector<4x16x16xf32> -> vector<4x16x16xf32>
    "tpu.trace_stop"() : () -> ()
    %30 = arith.addf %27, %29 : vector<4x16x16xf32>
    %c0_37 = arith.constant 0 : index
    %c8_38 = arith.constant 8 : index
    %c0_39 = arith.constant 0 : index
    %c0_40 = arith.constant 0 : index
    %31 = vector.load %arg6[%c0_37, %c8_38, %c0_39, %c0_40] : memref<1x12x16x16xf32, #tpu.memory_space<vmem>>, vector<1x4x16x16xf32>
    %32 = vector.shape_cast %31 : vector<1x4x16x16xf32> to vector<4x16x16xf32>
    %33 = vector.shape_cast %30 : vector<4x16x16xf32> to vector<1x4x16x16xf32>
    tpu.vector_store %arg6[%c0_37, %c8_38, %c0_39, %c0_40], %33 {strides = array<i32>} : memref<1x12x16x16xf32, #tpu.memory_space<vmem>>, vector<1x4x16x16xf32>,
    return
  }
  func.func @transform_0(%arg0: i32, %arg1: i32) -> (i32, i32, i32) {
    %c0_i32 = arith.constant 0 : i32
    %c0_i32_0 = arith.constant 0 : i32
    %c0_i32_1 = arith.constant 0 : i32
    %c0_i32_2 = arith.constant 0 : i32
    return %c0_i32, %c0_i32_0, %c0_i32_1 : i32, i32, i32
  }
  func.func @transform_1(%arg0: i32, %arg1: i32) -> (i32, i32, i32) {
    %c0_i32 = arith.constant 0 : i32
    %c0_i32_0 = arith.constant 0 : i32
    %c0_i32_1 = arith.constant 0 : i32
    %c0_i32_2 = arith.constant 0 : i32
    return %c0_i32, %c0_i32_0, %c0_i32_1 : i32, i32, i32
  }
  func.func @transform_2(%arg0: i32, %arg1: i32) -> (i32, i32, i32, i32) {
    %c0_i32 = arith.constant 0 : i32
    %c0_i32_0 = arith.constant 0 : i32
    %c0_i32_1 = arith.constant 0 : i32
    return %arg1, %c0_i32, %arg0, %c0_i32_0 : i32, i32, i32, i32
  }
  func.func @transform_3(%arg0: i32, %arg1: i32) -> (i32, i32, i32, i32) {
    %c0_i32 = arith.constant 0 : i32
    %c0_i32_0 = arith.constant 0 : i32
    %c0_i32_1 = arith.constant 0 : i32
    return %arg1, %c0_i32, %arg0, %c0_i32_0 : i32, i32, i32, i32
  }
  func.func @transform_4(%arg0: i32, %arg1: i32) -> (i32, i32, i32, i32) {
    %c0_i32 = arith.constant 0 : i32
    %c0_i32_0 = arith.constant 0 : i32
    %c0_i32_1 = arith.constant 0 : i32
    %c0_i32_2 = arith.constant 0 : i32
    return %arg0, %c0_i32, %c0_i32_0, %c0_i32_1 : i32, i32, i32, i32
  }
}

</mosaic_0001>

<bundles_post_ra>
// kernel: tpu_custom_call.1
= control target key start
LH: loop header
LB: loop body
LE: loop exit
PB: predicated region body
PF: predicated region fallthrough
CT: control target
= control target key end

     0   :  { %s2085_s0 = inlined_call_operand.vmem [shape: f32[4,16,32], index: 0, kind: input, shape index: {}]   ;;  %s2086_s1 = inlined_call_operand.vmem [shape: f32[4,32,16], index: 1, kind: input, shape index: {}]   ;;  %s2087_s2 = inlined_call_operand.hbm [shape: f32[2,4,32,32], index: 2, kind: input, shape index: {}]   ;;  %s2088_s3 = inlined_call_operand.hbm [shape: f32[2,4,32,32], index: 3, kind: input, shape index: {}]   ;;  %s2089_s4 = inlined_call_operand.hbm [shape: f32[1,12,16,16], index: 4, kind: output, shape index: {}]  }
   0x1   :  { %2091 = sst [smem:[#allocation11_spill]] %s2087_s2 }
   0x2   :  { %9 = vsyncpa [#allocation3], 0 }
   0x3   :  { %11 = vsyncpa [#allocation3 + $0x1], 0 }
   0x4   :  { %12 = vsyncpa [#allocation6], 0 }
   0x5   :  { %14 = vsyncpa [#allocation6 + $0x1], 0 }
   0x6   :  { %15 = vsyncpa [#allocation4], 0  ;;  %s1522_s15 = smov 0   ;;  %s1524_s16 = smov 0  }
   0x7   :  { %s1526_s17 = smov 0   ;;  %s1528_s18 = smov 0  }
   0x8   :  { %s1530_s19 = smov 0   ;;  %s1532_s20 = smov 0  }
   0x9 LB: > { %s2090_s21 = sadd.s32 4294967295, %s1489_s20   ;;  %s30_s22 = sadd.s32 1, %s1485_s19  ;;  %s1489_s20 = sphi %s1532_s20, %s21_s20   ;;  %s1485_s19 = sphi %s1530_s19, %s2101_s19   ;;  %s1481_s18 = sphi %s1528_s18, %s2100_s18   ;;  %s1477_s17 = sphi %s1526_s17, %s2099_s17   ;;  %s1473_s16 = sphi %s1524_s16, %s2098_s16   ;;  %s1469_s15 = sphi %s1522_s15, %s2097_s15  }
   0xa   : > { %p31_p0 = scmp.ge.s32.totalorder %s30_s22, 2  ;;  %s84_s23 = sadd.s32 1, %s1477_s17 }
   0xb   : > { %p91_p1 = scmp.ne.s32.totalorder %s1477_s17, %s1473_s16  ;;  %p92_p2 = scmp.eq.s32.totalorder %s1489_s20, 0 }
   0xc   : > { %s2103_s22 = smov (%p31_p0, %s30_s22), 0  ;;  %p97_p4 = scmp.ne.s32.totalorder %s1473_s16, %s1469_s15 }
   0xd   : > { %p1558_p3 = por %p92_p2, %p91_p1  ;;  %s79_s25 = ssub.s32 %s1485_s19, %s2103_s22 }
   0xe   : > { %p98_p5 = scmp.eq.s32.totalorder %s2090_s21, 0  ;;  %p82_p6 = scmp.eq.s32.totalorder %s79_s25, 0 }
   0xf   : > { %p1286_p8 = scmp.lt.s32.totalorder %s1489_s20, 2  ;;  %s1576_s28 = sand.u32 1, %s1477_s17  }
  0x10   : > { %p1567_p7 = por %p98_p5, %p97_p4  ;;  %s1269_s29 = sshll.u32 %s1485_s19, 7 }
  0x11   : > { %s1573_s27 = scalar_select %p82_p6, %s1477_s17, %s84_s23  }
  0x12   : > { %s1207_s30 = sshll.u32 %s1576_s28, 7  ;;  %s2094_s2 = sld [smem:[#allocation11_spill]] }
  0x13   : > { %s185_s9 = scalar_lea.vmem [#allocation2], %s1207_s30  ;;  %p1585_p9 = pnand %p1286_p8, %p1558_p3 }
  0x14   : > { %s195_s10 = sshll.u32 %s185_s9, 4  ;;  %p1213_p10 = scmp.ge.s32.totalorder %s1489_s20, 1  ;;  %s196_s10 = int_to_ptr.vmem [resolvable:$true] %s195_s10 }
  0x15   : > { %p227_p11 = scmp.lt.s32.totalorder %s1489_s20, 3  ;;  %s182_s12 = scalar_lea.sflag [#allocation3], %s1576_s28 }
  0x16   : > { %s1491_s13 = smov 128   ;;  %s1492_s14 = smov 8  }
  0x17   : > { %p228_p12 = pnand %p1213_p10, %p227_p11  ;;  %s216_s25 = scalar_lea.hbm %s2088_s3, %s1269_s29 }
  0x18   : > { %s192_s7 = scalar_lea.hbm %s2094_s2, %s1269_s29  ;;  %s217_s5 = sshll.u32 %s216_s25, 4  ;;  %s218_s5 = int_to_ptr.hbm [resolvable:$true] %s217_s5 }
  0x19   : > { %s193_s8 = sshll.u32 %s192_s7, 4  ;;  %s209_s24 = scalar_lea.vmem [#allocation5], %s1207_s30  ;;  %s194_s8 = int_to_ptr.hbm [resolvable:$true] %s193_s8 }
  0x1a   : > { %1282 = dma.hbm_to_vmem [thread:$0]  (!%p1585_p9), %s194_s8, 2048, %s196_s10, %s182_s12, %s1491_s13, %s1491_s13, %s1492_s14  }
  0x1b   : > { %s219_s6 = sshll.u32 %s209_s24, 4  ;;  %s206_s7 = scalar_lea.sflag [#allocation6], %s1576_s28  ;;  %s220_s6 = int_to_ptr.vmem [resolvable:$true] %s219_s6 }
  0x1c   : > { %1285 = dma.hbm_to_vmem [thread:$0]  (!%p1585_p9), %s218_s5, 2048, %s220_s6, %s206_s7, %s1491_s13, %s1491_s13, %s1492_s14  }
  0x1d   : > { %231 = sbr.rel (%p228_p12) target bundleno = 656 (0x290), region = 36  ;;  %s233_s9 = sand.u32 (!%p228_p12), 1, %s1473_s16  }
  0x1e   : > { %s1214_s21 = sshll.u32 (!%p228_p12), %s233_s9, 7  ;;  %s234_s2 = scalar_lea.sflag (!%p228_p12), [#allocation3], %s233_s9 }
  0x1f   : > { %s1601_s8 = scalar_lea.vmem (!%p228_p12), [#allocation2], %s1214_s21 }
  0x22   : > { %1456 = dma.done.wait (%p1567_p7), %s234_s2, 2048  }
  0x23   : > { %1458 = vsyncadd (%p1567_p7), %s234_s2, 4294965248  ;;  %s244_s29 = scalar_lea.sflag [#allocation6], %s233_s9  ;;  %s1607_s30 = scalar_lea.vmem [#allocation5], %s1214_s21 }
  0x24   : > { %1460 = dma.done.wait (%p1567_p7), %s244_s29, 2048  }
  0x25   : > { %1462 = vsyncadd (%p1567_p7), %s244_s29, 4294965248  ;;  %p1216_p13 = scmp.ne.s32.totalorder %s1481_s18, 0 }
  0x27   : > { %278 = sbr.rel (%p1216_p13) target bundleno = 69 (0x45), region = 48 }
  0x2c   : > { %vm279_vm0 = vcmask 130048   ;;  %v1493_v0 = vmov 0.0  }
  0x2d   : > { %280 = vst.msk [vmem:[#allocation7] sm:$0xff] %vm279_vm0, %v1493_v0 }
  0x2e   : > { %281 = vst.msk [vmem:[#allocation7 + $0x8] sm:$0xff] %vm279_vm0, %v1493_v0 }
  0x2f   : > { %282 = vst.msk [vmem:[#allocation7 + $0x10] sm:$0xff] %vm279_vm0, %v1493_v0 }
  0x30   : > { %283 = vst.msk [vmem:[#allocation7 + $0x18] sm:$0xff] %vm279_vm0, %v1493_v0 }
  0x31   : > { %284 = vst.msk [vmem:[#allocation7 + $0x20] sm:$0xff] %vm279_vm0, %v1493_v0 }
  0x32   : > { %285 = vst.msk [vmem:[#allocation7 + $0x28] sm:$0xff] %vm279_vm0, %v1493_v0 }
  0x33   : > { %286 = vst.msk [vmem:[#allocation7 + $0x30] sm:$0xff] %vm279_vm0, %v1493_v0 }
  0x34   : > { %287 = vst.msk [vmem:[#allocation7 + $0x38] sm:$0xff] %vm279_vm0, %v1493_v0 }
  0x35   : > { %288 = vst.msk [vmem:[#allocation7 + $0x40] sm:$0xff] %vm279_vm0, %v1493_v0 }
  0x36   : > { %289 = vst.msk [vmem:[#allocation7 + $0x48] sm:$0xff] %vm279_vm0, %v1493_v0 }
  0x37   : > { %290 = vst.msk [vmem:[#allocation7 + $0x50] sm:$0xff] %vm279_vm0, %v1493_v0 }
  0x38   : > { %291 = vst.msk [vmem:[#allocation7 + $0x58] sm:$0xff] %vm279_vm0, %v1493_v0 }
  0x39   : > { %292 = vst.msk [vmem:[#allocation7 + $0x60] sm:$0xff] %vm279_vm0, %v1493_v0 }
  0x3a   : > { %293 = vst.msk [vmem:[#allocation7 + $0x68] sm:$0xff] %vm279_vm0, %v1493_v0 }
  0x3b   : > { %294 = vst.msk [vmem:[#allocation7 + $0x70] sm:$0xff] %vm279_vm0, %v1493_v0 }
  0x3c   : > { %295 = vst.msk [vmem:[#allocation7 + $0x78] sm:$0xff] %vm279_vm0, %v1493_v0 }
  0x3d   : > { %296 = vst.msk [vmem:[#allocation7 + $0x80] sm:$0xff] %vm279_vm0, %v1493_v0 }
  0x3e   : > { %297 = vst.msk [vmem:[#allocation7 + $0x88] sm:$0xff] %vm279_vm0, %v1493_v0 }
  0x3f   : > { %298 = vst.msk [vmem:[#allocation7 + $0x90] sm:$0xff] %vm279_vm0, %v1493_v0 }
  0x40   : > { %299 = vst.msk [vmem:[#allocation7 + $0x98] sm:$0xff] %vm279_vm0, %v1493_v0 }
  0x41   : > { %300 = vst.msk [vmem:[#allocation7 + $0xa0] sm:$0xff] %vm279_vm0, %v1493_v0 }
  0x42   : > { %301 = vst.msk [vmem:[#allocation7 + $0xa8] sm:$0xff] %vm279_vm0, %v1493_v0 }
  0x43   : > { %302 = vst.msk [vmem:[#allocation7 + $0xb0] sm:$0xff] %vm279_vm0, %v1493_v0 }
  0x44   : > { %303 = vst.msk [vmem:[#allocation7 + $0xb8] sm:$0xff] %vm279_vm0, %v1493_v0 }
  0x45 PF: > { %v1639_v1 = vld [vmem:[%s1601_s8 + $0x58] sm:$0xff]  ;;  %v1653_v6 = vld [vmem:[%s1601_s8 + $0x50] sm:$0xff]  ;;  %v1669_v12 = vld [vmem:[%s1601_s8 + $0x48] sm:$0xff]  ;;  %vm384_vm1 = vcmask 261120   ;;  %vm625_vm2 = vcmask 130048   ;;  %s1494_s11 = smov [#allocation7]  }
  0x46   : > { %v1642_v2 = vld [vmem:[%s1607_s30 + $0x58] sm:$0xff]  ;;  %v1656_v7 = vld [vmem:[%s1607_s30 + $0x50] sm:$0xff]  ;;  %v1674_v14 = vld [vmem:[%s1607_s30 + $0x48] sm:$0xff]  ;;  %s1108_s12 = sshll.u32 %s1494_s11, 4  ;;  %s1110_s15 = sshll.u32 %s2089_s4, 4  ;;  %s1109_s12 = int_to_ptr.vmem [resolvable:$true] %s1108_s12  ;;  %s1111_s15 = int_to_ptr.hbm [resolvable:$true] %s1110_s15 }
  0x47   : > { %v1645_v3 = vld [vmem:[%s1601_s8 + $0x78] sm:$0xff]  ;;  %v379_v4 = vmul.f32 %v1642_v2, %v1639_v1  ;;  %v378_v9 = vmul.f32 %v1656_v7, %v1653_v6  ;;  %v1663_v10 = vld [vmem:[%s1601_s8 + $0x70] sm:$0xff]  ;;  %v1677_v15 = vld [vmem:[%s1601_s8 + $0x68] sm:$0xff]  ;;  %v377_v17 = vmul.f32 %v1674_v14, %v1669_v12  ;;  %s2096_s23 = sadd.s32 4294967295, %s1489_s20   ;;  %s1495_s25 = smov 128  }
  0x48   : > { %v1650_v5 = vld [vmem:[%s1607_s30 + $0x78] sm:$0xff]  ;;  %v1666_v11 = vld [vmem:[%s1607_s30 + $0x70] sm:$0xff]  ;;  %v1680_v16 = vld [vmem:[%s1607_s30 + $0x68] sm:$0xff]  ;;  %p1287_p0 = scmp.eq.s32.totalorder %s2096_s23, 1  ;;  %s1496_s5 = smov 8  }
  0x49   : > { %v383_v8 = vmul.f32 %v1650_v5, %v1645_v3  ;;  %461 = vmatpush.msra.mxu2 %v379_v4  ;;  %v382_v13 = vmul.f32 %v1666_v11, %v1663_v10  ;;  %v381_v18 = vmul.f32 %v1680_v16, %v1677_v15  ;;  %v1687_v19 = vld [vmem:[%s1601_s8 + $0x40] sm:$0xff]  ;;  %v1710_v26 = vld [vmem:[%s2085_s0 + $0x30] sm:$0xff]  ;;  %v1713_v27 = vld [vmem:[%s1601_s8 + $0x18] sm:$0xff] }
  0x4a   : > { %v1690_v20 = vld [vmem:[%s1607_s30 + $0x40] sm:$0xff]  ;;  %v1716_v28 = vld [vmem:[%s1607_s30 + $0x18] sm:$0xff]  ;;  %v1729_v33 = vld [vmem:[%s1601_s8 + $0x10] sm:$0xff] }
  0x4b   : > { %490 = vmatpush.msra.mxu3 %v383_v8  ;;  %v1693_v21 = vld [vmem:[%s1601_s8 + $0x60] sm:$0xff]  ;;  %462 = vmatpush.msra.mxu2 %v378_v9  ;;  %v376_v22 = vmul.f32 %v1690_v20, %v1687_v19  ;;  %v1719_v29 = vld [vmem:[%s1601_s8 + $0x38] sm:$0xff]  ;;  %v371_v31 = vmul.f32 %v1716_v28, %v1713_v27  ;;  %v1732_v34 = vld [vmem:[%s1607_s30 + $0x10] sm:$0xff] }
  0x4c   : > { %v1698_v23 = vld [vmem:[%s1607_s30 + $0x60] sm:$0xff]  ;;  %v1722_v30 = vld [vmem:[%s1607_s30 + $0x38] sm:$0xff]  ;;  %v1735_v35 = vld [vmem:[%s1601_s8 + $0x30] sm:$0xff]  ;;  %v370_v36 = vmul.f32 %v1732_v34, %v1729_v33 }
  0x4d   : > { %491 = vmatpush.msra.mxu3 %v382_v13  ;;  %v380_v24 = vmul.f32 %v1698_v23, %v1693_v21  ;;  %v1705_v25 = vld [vmem:[%s2085_s0 + $0x20] sm:$0xff]  ;;  %463 = vmatpush.msra.mxu2 %v377_v17  ;;  %v375_v32 = vmul.f32 %v1722_v30, %v1719_v29  ;;  %v1740_v37 = vld [vmem:[%s1607_s30 + $0x30] sm:$0xff]  ;;  %v1743_v38 = vld [vmem:[%s1601_s8 + $0x8] sm:$0xff] }
  0x4e   : > { %v1746_v39 = vld [vmem:[%s1607_s30 + $0x8] sm:$0xff]  ;;  %v374_v40 = vmul.f32 %v1740_v37, %v1735_v35  ;;  %v1759_v43 = vld [vmem:[%s1601_s8] sm:$0xff]  ;;  %403 = vmatpush.msra.mxu0 %v371_v31  ;;  %v1781_v50 = vld [vmem:[%s2086_s1 + $0x58] sm:$0xff] }
  0x4f   : > { %492 = vmatpush.msra.mxu3 %v381_v18  ;;  %464 = vmatpush.msra.mxu2 %v376_v22  ;;  %v1753_v41 = vld [vmem:[%s1601_s8 + $0x28] sm:$0xff]  ;;  %v369_v44 = vmul.f32 %v1746_v39, %v1743_v38  ;;  %v1766_v45 = vld [vmem:[%s1607_s30] sm:$0xff]  ;;  %v1786_v51 = vld [vmem:[%s2086_s1 + $0x78] sm:$0xff] }
  0x50   : > { %1221 = vmatmul.msk.f32.vlgmr.msra.gmra.mxu2 %vm384_vm1, %v1705_v25  ;;  %v1756_v42 = vld [vmem:[%s1607_s30 + $0x28] sm:$0xff]  ;;  %v1769_v46 = vld [vmem:[%s1601_s8 + $0x20] sm:$0xff]  ;;  %432 = vmatpush.msra.mxu1 %v375_v32  ;;  %v368_v49 = vmul.f32 %v1766_v45, %v1759_v43  ;;  %v1794_v53 = vld [vmem:[%s2086_s1 + $0x50] sm:$0xff] }
  0x51   : > { %493 = vmatpush.msra.mxu3 %v380_v24  ;;  %v1772_v47 = vld [vmem:[%s1607_s30 + $0x20] sm:$0xff]  ;;  %v373_v48 = vmul.f32 %v1756_v42, %v1753_v41  ;;  %404 = vmatpush.msra.mxu0 %v370_v36  ;;  %v1799_v54 = vld [vmem:[%s2086_s1 + $0x70] sm:$0xff]  ;;  %v1804_v55 = vld [vmem:[%s2085_s0 + $0x28] sm:$0xff] }
  0x52   : > { %1223 = vmatmul.msk.f32.vlgmr.msra.gmra.mxu3 %vm384_vm1, %v1710_v26  ;;  %433 = vmatpush.msra.mxu1 %v374_v40  ;;  %v372_v52 = vmul.f32 %v1772_v47, %v1769_v46  ;;  %v1810_v56 = vld [vmem:[%s2085_s0 + $0x38] sm:$0xff]  ;;  %v1815_v57 = vld [vmem:[%s2085_s0] sm:$0xff]  ;;  %v1821_v58 = vld [vmem:[%s2085_s0 + $0x10] sm:$0xff] }
  0x53   : > { %577 = vmatpush.msrb.mxu2 %v1781_v50  ;;  %405 = vmatpush.msra.mxu0 %v369_v44  ;;  %v1827_v59 = vld [vmem:[%s2086_s1 + $0x48] sm:$0xff]  ;;  %v1843_v61 = vld [vmem:[%s2086_s1 + $0x40] sm:$0xff]  ;;  %v1866_v0 = vld [vmem:[%s2085_s0 + $0x18] sm:$0xff] }
  0x54   : > { %606 = vmatpush.msrb.mxu3 %v1786_v51  ;;  %434 = vmatpush.msra.mxu1 %v373_v48  ;;  %v1834_v60 = vld [vmem:[%s2086_s1 + $0x68] sm:$0xff]  ;;  %v1851_v62 = vld [vmem:[%s2086_s1 + $0x60] sm:$0xff]  ;;  %v1891_v4 = vld [vmem:[%s2086_s1 + $0x10] sm:$0xff] }
  0x55   : > { %578 = vmatpush.msrb.mxu2 %v1794_v53  ;;  %406 = vmatpush.msra.mxu0 %v368_v49  ;;  %v1860_v63 = vld [vmem:[%s2085_s0 + $0x8] sm:$0xff]  ;;  %v363_v32 = vld [vmem:[#allocation7 + $0x18] sm:$0xff] }
  0x56   : > { %607 = vmatpush.msrb.mxu3 %v1799_v54  ;;  %435 = vmatpush.msra.mxu1 %v372_v52  ;;  %v1905_v8 = vld [vmem:[%s2086_s1 + $0x8] sm:$0xff]  ;;  %v637_v52 = vld [vmem:[#allocation7 + $0x50] sm:$0xff] }
  0x57   : > { %1217 = vmatmul.msk.f32.vlgmr.msra.gmra.mxu0 %vm384_vm1, %v1815_v57  ;;  %1219 = vmatmul.msk.f32.vlgmr.msra.gmra.mxu1 %vm384_vm1, %v1821_v58  ;;  %v1910_v9 = vld [vmem:[%s2086_s1 + $0x28] sm:$0xff] }
  0x58   : > { %1222 = vmatmul.msk.f32.gmra.mxu2 %vm384_vm1, %v1804_v55  ;;  %608 = vmatpush.msrb.mxu3 %v1834_v60  ;;  %v361_v31 = vld [vmem:[#allocation7 + $0x8] sm:$0xff] }
  0x59   : > { %579 = vmatpush.msrb.mxu2 %v1827_v59 }
  0x5a   : > { %1224 = vmatmul.msk.f32.gmra.mxu3 %vm384_vm1, %v1810_v56 }
  0x5b   : > { %580 = vmatpush.msrb.mxu2 %v1843_v61  ;;  %609 = vmatpush.msrb.mxu3 %v1851_v62 }
  0x5d   : > { %701 = vmatpush.msra.mxu2 %v1639_v1  ;;  %724 = vmatpush.msra.mxu3 %v1645_v3  ;;  %v1881_v1 = vld [vmem:[%s2086_s1 + $0x18] sm:$0xff] }
  0x5e   : > { %v1886_v3 = vld [vmem:[%s2086_s1 + $0x38] sm:$0xff]  ;;  %519 = vmatpush.msrb.mxu0 %v1881_v1 }
  0x5f   : > { %702 = vmatpush.msra.mxu2 %v1653_v6  ;;  %725 = vmatpush.msra.mxu3 %v1663_v10  ;;  %v1898_v6 = vld [vmem:[%s2086_s1 + $0x30] sm:$0xff]  ;;  %v1915_v10 = vld [vmem:[%s2086_s1] sm:$0xff] }
  0x60   : > { %1218 = vmatmul.msk.f32.gmra.mxu0 %vm384_vm1, %v1860_v63  ;;  %1220 = vmatmul.msk.f32.gmra.mxu1 %vm384_vm1, %v1866_v0 }
  0x61   : > { %703 = vmatpush.msra.mxu2 %v1669_v12  ;;  %726 = vmatpush.msra.mxu3 %v1677_v15  ;;  %v1922_v12 = vld [vmem:[%s2086_s1 + $0x20] sm:$0xff] }
  0x62   : > { %548 = vmatpush.msrb.mxu1 %v1886_v3  ;;  %520 = vmatpush.msrb.mxu0 %v1891_v4 }
  0x63   : > { %704 = vmatpush.msra.mxu2 %v1687_v19  ;;  %727 = vmatpush.msra.mxu3 %v1693_v21 }
  0x64   : > { %549 = vmatpush.msrb.mxu1 %v1898_v6  ;;  %521 = vmatpush.msrb.mxu0 %v1905_v8 }
  0x66   : > { %550 = vmatpush.msrb.mxu1 %v1910_v9  ;;  %522 = vmatpush.msrb.mxu0 %v1915_v10 }
  0x68   : > { %551 = vmatpush.msrb.mxu1 %v1922_v12  ;;  %655 = vmatpush.msra.mxu0 %v1713_v27 }
  0x6a   : > { %678 = vmatpush.msra.mxu1 %v1719_v29  ;;  %656 = vmatpush.msra.mxu0 %v1729_v33 }
  0x6c   : > { %679 = vmatpush.msra.mxu1 %v1735_v35  ;;  %657 = vmatpush.msra.mxu0 %v1743_v38 }
  0x6e   : > { %680 = vmatpush.msra.mxu1 %v1753_v41  ;;  %658 = vmatpush.msra.mxu0 %v1759_v43 }
  0x70   : > { %681 = vmatpush.msra.mxu1 %v1769_v46 }
  0xd3   : > { %v466_v13 = vpop.f32.mrf.mxu2 }
  0xd4   : > { %1229 = vmatmul.msk.f32.vlgmr.msrb.gmra.mxu2 %vm384_vm1, %v466_v13  ;;  %v408_v17 = vpop.f32.mrf.mxu0  ;;  %v437_v18 = vpop.f32.mrf.mxu1 }
  0xd5   : > { %v495_v15 = vpop.f32.mrf.mxu3  ;;  %811 = vmatpush.msrb.mxu2 %v1781_v50  ;;  %1225 = vmatmul.msk.f32.vlgmr.msrb.gmra.mxu0 %vm384_vm1, %v408_v17 }
  0xd6   : > { %1231 = vmatmul.msk.f32.vlgmr.msrb.gmra.mxu3 %vm384_vm1, %v495_v15  ;;  %1227 = vmatmul.msk.f32.vlgmr.msrb.gmra.mxu1 %vm384_vm1, %v437_v18 }
  0xd7   : > { %840 = vmatpush.msrb.mxu3 %v1786_v51  ;;  %812 = vmatpush.msrb.mxu2 %v1794_v53 }
  0xd8   : > { %753 = vmatpush.msrb.mxu0 %v1881_v1  ;;  %782 = vmatpush.msrb.mxu1 %v1886_v3 }
  0xd9   : > { %841 = vmatpush.msrb.mxu3 %v1799_v54  ;;  %813 = vmatpush.msrb.mxu2 %v1827_v59 }
  0xda   : > { %754 = vmatpush.msrb.mxu0 %v1891_v4  ;;  %783 = vmatpush.msrb.mxu1 %v1898_v6 }
  0xdb   : > { %842 = vmatpush.msrb.mxu3 %v1834_v60  ;;  %v469_v19 = vpop.f32.mrf.mxu2  ;;  %814 = vmatpush.msrb.mxu2 %v1843_v61 }
  0xdc   : > { %1230 = vmatmul.msk.f32.gmra.mxu2 %vm384_vm1, %v469_v19  ;;  %755 = vmatpush.msrb.mxu0 %v1905_v8 }
  0xdd   : > { %v498_v21 = vpop.f32.mrf.mxu3  ;;  %843 = vmatpush.msrb.mxu3 %v1851_v62  ;;  %v411_v22 = vpop.f32.mrf.mxu0  ;;  %784 = vmatpush.msrb.mxu1 %v1910_v9 }
  0xde   : > { %1232 = vmatmul.msk.f32.gmra.mxu3 %vm384_vm1, %v498_v21  ;;  %v440_v24 = vpop.f32.mrf.mxu1  ;;  %1226 = vmatmul.msk.f32.gmra.mxu0 %vm384_vm1, %v411_v22 }
  0xdf   : > { %1228 = vmatmul.msk.f32.gmra.mxu1 %vm384_vm1, %v440_v24  ;;  %756 = vmatpush.msrb.mxu0 %v1915_v10 }
  0xe0   : > { %785 = vmatpush.msrb.mxu1 %v1922_v12 }
  0xe4   : > { %1237 = vmatmul.msk.f32.vlgmr.msra.gmra.mxu2 %vm384_vm1, %v1705_v25 }
  0xe5   : > { %934 = vmatpush.msra.mxu2 %v1642_v2  ;;  %v360_v2 = vld [vmem:[#allocation7] sm:$0xff] }
  0xe6   : > { %1239 = vmatmul.msk.f32.vlgmr.msra.gmra.mxu3 %vm384_vm1, %v1710_v26  ;;  %1233 = vmatmul.msk.f32.vlgmr.msra.gmra.mxu0 %vm384_vm1, %v1815_v57 }
  0xe7   : > { %957 = vmatpush.msra.mxu3 %v1650_v5  ;;  %935 = vmatpush.msra.mxu2 %v1656_v7  ;;  %v362_v5 = vld [vmem:[#allocation7 + $0x10] sm:$0xff] }
  0xe8   : > { %1235 = vmatmul.msk.f32.vlgmr.msra.gmra.mxu1 %vm384_vm1, %v1821_v58  ;;  %888 = vmatpush.msra.mxu0 %v1716_v28 }
  0xe9   : > { %958 = vmatpush.msra.mxu3 %v1666_v11  ;;  %936 = vmatpush.msra.mxu2 %v1674_v14  ;;  %v364_v11 = vld [vmem:[#allocation7 + $0x20] sm:$0xff] }
  0xea   : > { %911 = vmatpush.msra.mxu1 %v1722_v30  ;;  %889 = vmatpush.msra.mxu0 %v1732_v34  ;;  %v365_v34 = vld [vmem:[#allocation7 + $0x28] sm:$0xff] }
  0xeb   : > { %959 = vmatpush.msra.mxu3 %v1680_v16  ;;  %937 = vmatpush.msra.mxu2 %v1690_v20  ;;  %v366_v20 = vld [vmem:[#allocation7 + $0x30] sm:$0xff] }
  0xec   : > { %1238 = vmatmul.msk.f32.gmra.mxu2 %vm384_vm1, %v1804_v55  ;;  %912 = vmatpush.msra.mxu1 %v1740_v37  ;;  %v367_v37 = vld [vmem:[#allocation7 + $0x38] sm:$0xff] }
  0xed   : > { %960 = vmatpush.msra.mxu3 %v1698_v23  ;;  %890 = vmatpush.msra.mxu0 %v1746_v39 }
  0xee   : > { %1240 = vmatmul.msk.f32.gmra.mxu3 %vm384_vm1, %v1810_v56  ;;  %1234 = vmatmul.msk.f32.gmra.mxu0 %vm384_vm1, %v1860_v63 }
  0xef   : > { %913 = vmatpush.msra.mxu1 %v1756_v42  ;;  %891 = vmatpush.msra.mxu0 %v1766_v45 }
  0xf0   : > { %1236 = vmatmul.msk.f32.gmra.mxu1 %vm384_vm1, %v1866_v0 }
  0xf1   : > { %914 = vmatpush.msra.mxu1 %v1772_v47 }
 0x152   : > { %v524_v7 = vpop.f32.mrf.mxu0 }
 0x153   : > { %v617_v14 = vadd.f32 %v524_v7, %v360_v2  ;;  %v553_v16 = vpop.f32.mrf.mxu1  ;;  %v868_v2 = vld [vmem:[#allocation7 + $0x80] sm:$0xff] }
 0x154   : > { %v619_v23 = vadd.f32 %v553_v16, %v362_v5  ;;  %v870_v5 = vld [vmem:[#allocation7 + $0x90] sm:$0xff] }
 0x155   : > { %626 = vst.msk [vmem:[#allocation7] sm:$0xff] %vm625_vm2, %v617_v14 }
 0x156   : > { %628 = vst.msk [vmem:[#allocation7 + $0x10] sm:$0xff] %vm625_vm2, %v619_v23  ;;  %v871_v23 = vld [vmem:[#allocation7 + $0x98] sm:$0xff] }
 0x157   : > { %v582_v27 = vpop.f32.mrf.mxu2 }
 0x158   : > { %v621_v28 = vadd.f32 %v582_v27, %v364_v11 }
 0x159   : > { %v611_v29 = vpop.f32.mrf.mxu3 }
 0x15a   : > { %v623_v30 = vadd.f32 %v611_v29, %v366_v20  ;;  %630 = vst.msk [vmem:[#allocation7 + $0x20] sm:$0xff] %vm625_vm2, %v621_v28  ;;  %v869_v20 = vld [vmem:[#allocation7 + $0x88] sm:$0xff] }
 0x15b   : > { %v527_v33 = vpop.f32.mrf.mxu0 }
 0x15c   : > { %632 = vst.msk [vmem:[#allocation7 + $0x30] sm:$0xff] %vm625_vm2, %v623_v30  ;;  %v618_v35 = vadd.f32 %v527_v33, %v361_v31  ;;  %v556_v36 = vpop.f32.mrf.mxu1  ;;  %v872_v31 = vld [vmem:[#allocation7 + $0xa0] sm:$0xff] }
 0x15d   : > { %v620_v38 = vadd.f32 %v556_v36, %v363_v32  ;;  %v874_v32 = vld [vmem:[#allocation7 + $0xb0] sm:$0xff] }
 0x15e   : > { %627 = vst.msk [vmem:[#allocation7 + $0x8] sm:$0xff] %vm625_vm2, %v618_v35 }
 0x15f   : > { %v585_v39 = vpop.f32.mrf.mxu2  ;;  %629 = vst.msk [vmem:[#allocation7 + $0x18] sm:$0xff] %vm625_vm2, %v620_v38  ;;  %v875_v38 = vld [vmem:[#allocation7 + $0xb8] sm:$0xff] }
 0x160   : > { %v622_v40 = vadd.f32 %v585_v39, %v365_v34 }
 0x161   : > { %v614_v41 = vpop.f32.mrf.mxu3 }
 0x162   : > { %v624_v42 = vadd.f32 %v614_v41, %v367_v37  ;;  %631 = vst.msk [vmem:[#allocation7 + $0x28] sm:$0xff] %vm625_vm2, %v622_v40  ;;  %v873_v37 = vld [vmem:[#allocation7 + $0xa8] sm:$0xff] }
 0x163   : > { %v660_v43 = vpop.f32.mrf.mxu0 }
 0x164   : > { %633 = vst.msk [vmem:[#allocation7 + $0x38] sm:$0xff] %vm625_vm2, %v624_v42  ;;  %1241 = vmatmul.msk.f32.vlgmr.msrb.gmra.mxu0 %vm384_vm1, %v660_v43 }
 0x165   : > { %v683_v44 = vpop.f32.mrf.mxu1  ;;  %986 = vmatpush.msrb.mxu0 %v1881_v1 }
 0x166   : > { %1243 = vmatmul.msk.f32.vlgmr.msrb.gmra.mxu1 %vm384_vm1, %v683_v44 }
 0x167   : > { %v706_v45 = vpop.f32.mrf.mxu2  ;;  %1015 = vmatpush.msrb.mxu1 %v1886_v3  ;;  %987 = vmatpush.msrb.mxu0 %v1891_v4  ;;  %v640_v4 = vld [vmem:[#allocation7 + $0x68] sm:$0xff] }
 0x168   : > { %1245 = vmatmul.msk.f32.vlgmr.msrb.gmra.mxu2 %vm384_vm1, %v706_v45 }
 0x169   : > { %v729_v46 = vpop.f32.mrf.mxu3  ;;  %1044 = vmatpush.msrb.mxu2 %v1781_v50  ;;  %1016 = vmatpush.msrb.mxu1 %v1898_v6  ;;  %v642_v6 = vld [vmem:[#allocation7 + $0x78] sm:$0xff] }
 0x16a   : > { %1247 = vmatmul.msk.f32.vlgmr.msrb.gmra.mxu3 %vm384_vm1, %v729_v46  ;;  %988 = vmatpush.msrb.mxu0 %v1905_v8 }
 0x16b   : > { %1073 = vmatpush.msrb.mxu3 %v1786_v51  ;;  %1045 = vmatpush.msrb.mxu2 %v1794_v53  ;;  %v663_v47 = vpop.f32.mrf.mxu0  ;;  %v635_v51 = vld [vmem:[#allocation7 + $0x40] sm:$0xff] }
 0x16c   : > { %1017 = vmatpush.msrb.mxu1 %v1910_v9  ;;  %1242 = vmatmul.msk.f32.gmra.mxu0 %vm384_vm1, %v663_v47 }
 0x16d   : > { %1074 = vmatpush.msrb.mxu3 %v1799_v54  ;;  %v686_v48 = vpop.f32.mrf.mxu1  ;;  %1046 = vmatpush.msrb.mxu2 %v1827_v59  ;;  %v638_v59 = vld [vmem:[#allocation7 + $0x58] sm:$0xff] }
 0x16e   : > { %1244 = vmatmul.msk.f32.gmra.mxu1 %vm384_vm1, %v686_v48  ;;  %989 = vmatpush.msrb.mxu0 %v1915_v10 }
 0x16f   : > { %1075 = vmatpush.msrb.mxu3 %v1834_v60  ;;  %v709_v49 = vpop.f32.mrf.mxu2  ;;  %1047 = vmatpush.msrb.mxu2 %v1843_v61  ;;  %v641_v60 = vld [vmem:[#allocation7 + $0x70] sm:$0xff] }
 0x170   : > { %1246 = vmatmul.msk.f32.gmra.mxu2 %vm384_vm1, %v709_v49  ;;  %1018 = vmatpush.msrb.mxu1 %v1922_v12 }
 0x171   : > { %v732_v50 = vpop.f32.mrf.mxu3  ;;  %1076 = vmatpush.msrb.mxu3 %v1851_v62 }
 0x172   : > { %1248 = vmatmul.msk.f32.gmra.mxu3 %vm384_vm1, %v732_v50 }
 0x174   : > { %1249 = vmatmul.msk.f32.vlgmr.msra.gmra.mxu0 %vm384_vm1, %v1815_v57 }
 0x176   : > { %1251 = vmatmul.msk.f32.vlgmr.msra.gmra.mxu1 %vm384_vm1, %v1821_v58  ;;  %v639_v58 = vld [vmem:[#allocation7 + $0x60] sm:$0xff] }
 0x178   : > { %1253 = vmatmul.msk.f32.vlgmr.msra.gmra.mxu2 %vm384_vm1, %v1705_v25 }
 0x17a   : > { %1255 = vmatmul.msk.f32.vlgmr.msra.gmra.mxu3 %vm384_vm1, %v1710_v26  ;;  %v636_v26 = vld [vmem:[#allocation7 + $0x48] sm:$0xff] }
 0x17c   : > { %1250 = vmatmul.msk.f32.gmra.mxu0 %vm384_vm1, %v1860_v63 }
 0x17e   : > { %1252 = vmatmul.msk.f32.gmra.mxu1 %vm384_vm1, %v1866_v0 }
 0x180   : > { %1254 = vmatmul.msk.f32.gmra.mxu2 %vm384_vm1, %v1804_v55 }
 0x182   : > { %1256 = vmatmul.msk.f32.gmra.mxu3 %vm384_vm1, %v1810_v56 }
 0x1e1   : > { %v758_v53 = vpop.f32.mrf.mxu0 }
 0x1e2   : > { %v851_v54 = vadd.f32 %v758_v53, %v635_v51 }
 0x1e3   : > { %v787_v25 = vpop.f32.mrf.mxu1 }
 0x1e4   : > { %v853_v57 = vadd.f32 %v787_v25, %v637_v52  ;;  %859 = vst.msk [vmem:[#allocation7 + $0x40] sm:$0xff] %vm625_vm2, %v851_v54 }
 0x1e6   : > { %861 = vst.msk [vmem:[#allocation7 + $0x50] sm:$0xff] %vm625_vm2, %v853_v57 }
 0x1e9   : > { %v761_v61 = vpop.f32.mrf.mxu0 }
 0x1ea   : > { %v852_v55 = vadd.f32 %v761_v61, %v636_v26 }
 0x1eb   : > { %v816_v62 = vpop.f32.mrf.mxu2  ;;  %v790_v63 = vpop.f32.mrf.mxu1 }
 0x1ec   : > { %v855_v0 = vadd.f32 %v816_v62, %v639_v58  ;;  %v854_v1 = vadd.f32 %v790_v63, %v638_v59  ;;  %860 = vst.msk [vmem:[#allocation7 + $0x48] sm:$0xff] %vm625_vm2, %v852_v55 }
 0x1ed   : > { %v845_v56 = vpop.f32.mrf.mxu3 }
 0x1ee   : > { %v857_v3 = vadd.f32 %v845_v56, %v641_v60  ;;  %863 = vst.msk [vmem:[#allocation7 + $0x60] sm:$0xff] %vm625_vm2, %v855_v0 }
 0x1ef   : > { %862 = vst.msk [vmem:[#allocation7 + $0x58] sm:$0xff] %vm625_vm2, %v854_v1 }
 0x1f0   : > { %865 = vst.msk [vmem:[#allocation7 + $0x70] sm:$0xff] %vm625_vm2, %v857_v3 }
 0x1f1   : > { %v893_v8 = vpop.f32.mrf.mxu0 }
 0x1f2   : > { %1257 = vmatmul.msk.f32.vlgmr.msrb.gmra.mxu0 %vm384_vm1, %v893_v8 }
 0x1f3   : > { %v819_v9 = vpop.f32.mrf.mxu2  ;;  %v916_v10 = vpop.f32.mrf.mxu1 }
 0x1f4   : > { %v856_v12 = vadd.f32 %v819_v9, %v640_v4  ;;  %1259 = vmatmul.msk.f32.vlgmr.msrb.gmra.mxu1 %vm384_vm1, %v916_v10 }
 0x1f5   : > { %v848_v13 = vpop.f32.mrf.mxu3 }
 0x1f6   : > { %v858_v15 = vadd.f32 %v848_v13, %v642_v6  ;;  %864 = vst.msk [vmem:[#allocation7 + $0x68] sm:$0xff] %vm625_vm2, %v856_v12 }
 0x1f8   : > { %866 = vst.msk [vmem:[#allocation7 + $0x78] sm:$0xff] %vm625_vm2, %v858_v15 }
 0x1f9   : > { %v896_v17 = vpop.f32.mrf.mxu0 }
 0x1fa   : > { %1258 = vmatmul.msk.f32.gmra.mxu0 %vm384_vm1, %v896_v17 }
 0x1fb   : > { %v939_v18 = vpop.f32.mrf.mxu2  ;;  %v919_v19 = vpop.f32.mrf.mxu1 }
 0x1fc   : > { %1261 = vmatmul.msk.f32.vlgmr.msrb.gmra.mxu2 %vm384_vm1, %v939_v18  ;;  %1260 = vmatmul.msk.f32.gmra.mxu1 %vm384_vm1, %v919_v19 }
 0x1fd   : > { %v962_v21 = vpop.f32.mrf.mxu3 }
 0x1fe   : > { %1263 = vmatmul.msk.f32.vlgmr.msrb.gmra.mxu3 %vm384_vm1, %v962_v21 }
 0x203   : > { %v942_v22 = vpop.f32.mrf.mxu2 }
 0x204   : > { %1262 = vmatmul.msk.f32.gmra.mxu2 %vm384_vm1, %v942_v22 }
 0x205   : > { %v965_v24 = vpop.f32.mrf.mxu3 }
 0x206   : > { %1264 = vmatmul.msk.f32.gmra.mxu3 %vm384_vm1, %v965_v24 }
 0x26f   : > { %v991_v7 = vpop.f32.mrf.mxu0 }
 0x270   : > { %v1084_v11 = vadd.f32 %v991_v7, %v868_v2 }
 0x271   : > { %v1020_v14 = vpop.f32.mrf.mxu1 }
 0x272   : > { %v1086_v16 = vadd.f32 %v1020_v14, %v870_v5  ;;  %1092 = vst.msk [vmem:[#allocation7 + $0x80] sm:$0xff] %vm625_vm2, %v1084_v11 }
 0x274   : > { %1094 = vst.msk [vmem:[#allocation7 + $0x90] sm:$0xff] %vm625_vm2, %v1086_v16 }
 0x277   : > { %v994_v27 = vpop.f32.mrf.mxu0 }
 0x278   : > { %v1085_v28 = vadd.f32 %v994_v27, %v869_v20 }
 0x279   : > { %v1023_v29 = vpop.f32.mrf.mxu1 }
 0x27a   : > { %v1087_v30 = vadd.f32 %v1023_v29, %v871_v23  ;;  %1093 = vst.msk [vmem:[#allocation7 + $0x88] sm:$0xff] %vm625_vm2, %v1085_v28 }
 0x27c   : > { %1095 = vst.msk [vmem:[#allocation7 + $0x98] sm:$0xff] %vm625_vm2, %v1087_v30 }
 0x27f   : > { %v1049_v33 = vpop.f32.mrf.mxu2 }
 0x280   : > { %v1088_v34 = vadd.f32 %v1049_v33, %v872_v31 }
 0x281   : > { %v1078_v35 = vpop.f32.mrf.mxu3 }
 0x282   : > { %v1090_v36 = vadd.f32 %v1078_v35, %v874_v32  ;;  %1096 = vst.msk [vmem:[#allocation7 + $0xa0] sm:$0xff] %vm625_vm2, %v1088_v34 }
 0x284   : > { %1098 = vst.msk [vmem:[#allocation7 + $0xb0] sm:$0xff] %vm625_vm2, %v1090_v36 }
 0x287   : > { %v1052_v39 = vpop.f32.mrf.mxu2 }
 0x288   : > { %v1089_v40 = vadd.f32 %v1052_v39, %v873_v37 }
 0x289   : > { %v1081_v41 = vpop.f32.mrf.mxu3 }
 0x28a   : > { %v1091_v42 = vadd.f32 %v1081_v41, %v875_v38  ;;  %1097 = vst.msk [vmem:[#allocation7 + $0xa8] sm:$0xff] %vm625_vm2, %v1089_v40 }
 0x28c   : > { %1099 = vst.msk [vmem:[#allocation7 + $0xb8] sm:$0xff] %vm625_vm2, %v1091_v42 }
 0x28d   : > { %1276 = dma.vmem_to_hbm [thread:$0]  (%p1287_p0), %s1109_s12, 3072, %s1111_s15, [#allocation4], %s1495_s25, %s1495_s25, %s1496_s5  }
 0x28e   : > { %1464 = dma.done.wait (%p1287_p0), [#allocation4], 3072  }
 0x28f   : > { %1466 = vsyncadd (%p1287_p0), [#allocation4], 4294964224 }
 0x290 PF: > { %s21_s20 = sadd.s32 1, %s1489_s20   ;;  %s2097_s15 = smov %s1473_s16 }
 0x291   : > { %p18_p1 = scmp.ge.s32.totalorder %s21_s20, 4   ;;  %s2098_s16 = smov %s1477_s17 }
 0x292   : > { %s2099_s17 = smov %s1573_s27  ;;  %s2100_s18 = smov %s1485_s19 }
 0x293   : > { %s2101_s19 = smov %s2103_s22  ;;  %20 = sbr.rel (!%p18_p1) target bundleno = 9 (0x9), region = 93 }
 0x298   :  { %1127 = vsyncpa [#allocation3], 1 }
 0x299   :  { %1129 = vsyncpa [#allocation3 + $0x1], 1 }
 0x29a   :  { %1130 = vsyncpa [#allocation6], 1 }
 0x29b   :  { %1132 = vsyncpa [#allocation6 + $0x1], 1 }
 0x29c   :  { %1133 = vsyncpa [#allocation4], 1 }
 0x29d   :  { %1135 = vsyncpa [#allocation4 + $0x1], 1 }

</bundles_post_ra>
